<compile_context>
chip_gen: v5e
topology: v5e:2x2
jax: 0.10.0
libtpu: 0.0.40
codegen_flags: <defaults>
</compile_context>

<pallas_src>
import jax
import jax.numpy as jnp
from jax import lax
from jax.experimental import pallas as pl
from jax.experimental.pallas import tpu as pltpu


def ensemble_mlp_kernel(x_ref, w1T_ref, b1_ref, w2T_ref, b2_ref, oT_ref):
    # fc1: contract over the feature axis of both operands (NT matmul):
    #   (H, in) . (TB, in) -> (H, TB)   -- batch stays on the lane axis.
    h = lax.dot_general(
        w1T_ref[...], x_ref[...],
        dimension_numbers=(((1,), (1,)), ((), ())),
        preferred_element_type=jnp.float32,
    )
    h = jnp.maximum(h + b1_ref[...], 0.0)          # bias bcast over lanes; ReLU on VPU (f32)
    # fc2: (out, H) @ (H, TB) -> (out, TB); lane-dense output block.
    y = jnp.dot(w2T_ref[...], h, preferred_element_type=jnp.float32)
    oT_ref[...] = (y + b2_ref[...]).astype(oT_ref.dtype)


def ensemble_forward(x, w1, b1, w2, b2, *, block_b=8192):
    """y = relu(x @ w1 + b1) @ w2 + b2.

    x : (B, input_size); w1 : (input_size, hidden); b1 : (hidden,)
    w2 : (hidden, output_size); b2 : (output_size,)   -> returns (B, output_size)
    """
    B, in_size = x.shape
    hidden = w1.shape[1]
    out_size = w2.shape[1]

    # Auto-size the lane tile: multiple of 128, <= requested block_b, and small
    # enough that (when B allows) the grid has >=4 steps so each v7x core keeps
    # >=2 pipelined steps.  Tiny batches collapse to a single 128-lane block.
    target_steps = 4
    per_step = pl.cdiv(pl.cdiv(B, target_steps), 128) * 128
    bb = max(128, min(block_b, per_step))

    # Layout plumbing for the small, grid-resident operands only (negligible bytes).
    w1T = w1.T                                      # (H, in)
    b1c = b1.reshape(hidden, 1)                     # (H, 1)   broadcast over lanes
    w2T = w2.T                                      # (out, H)
    b2c = b2.reshape(out_size, 1)                   # (out, 1)

    yT = pl.pallas_call(
        ensemble_mlp_kernel,
        out_shape=jax.ShapeDtypeStruct((out_size, B), x.dtype),
        grid=(pl.cdiv(B, bb),),
        in_specs=[
            pl.BlockSpec((bb, in_size), lambda i: (i, 0)),        # x tile (pipelined, native layout)
            pl.BlockSpec((hidden, in_size), lambda i: (0, 0)),    # W1^T (resident)
            pl.BlockSpec((hidden, 1), lambda i: (0, 0)),          # b1   (resident)
            pl.BlockSpec((out_size, hidden), lambda i: (0, 0)),   # W2^T (resident)
            pl.BlockSpec((out_size, 1), lambda i: (0, 0)),        # b2   (resident)
        ],
        out_specs=pl.BlockSpec((out_size, bb), lambda i: (0, i)),
        compiler_params=pltpu.CompilerParams(
            dimension_semantics=("parallel",)),                   # batch axis -> 2 TCs on v7x
    )(x, w1T, b1c, w2T, b2c)

    # Tiny (out_size x B) transpose back to batch-major, matching the PyTorch module.
    return yT.T


if __name__ == "__main__":
    # Ensemble of 4 base-model predictions, hidden=32, scalar regression output.
    input_size, hidden_size, output_size = 4, 32, 1
    batch = 8

    key = jax.random.PRNGKey(0)
    kx, k1, k2, k3, k4 = jax.random.split(key, 5)

    # Deterministic init mimicking nn.Linear default: U(-1/sqrt(fan_in), 1/sqrt(fan_in))
    lim1 = 1.0 / jnp.sqrt(jnp.float32(input_size))
    lim2 = 1.0 / jnp.sqrt(jnp.float32(hidden_size))
    w1 = jax.random.uniform(k1, (input_size, hidden_size), jnp.float32, -lim1, lim1)
    b1 = jax.random.uniform(k2, (hidden_size,), jnp.float32, -lim1, lim1)
    w2 = jax.random.uniform(k3, (hidden_size, output_size), jnp.float32, -lim2, lim2)
    b2 = jax.random.uniform(k4, (output_size,), jnp.float32, -lim2, lim2)

    fwd = jax.jit(ensemble_forward)

    # Small case (matches the module's intended use): single partial block.
    x = jax.random.normal(kx, (batch, input_size), jnp.float32)
    out = jax.block_until_ready(fwd(x, w1, b1, w2, b2))
    ref = jnp.maximum(x @ w1 + b1, 0.0) @ w2 + b2
    assert out.shape == (batch, output_size)
    assert jnp.allclose(out, ref, atol=1e-4, rtol=1e-4)

    # Larger, non-multiple batch: exercises the multi-step pipelined grid and
    # the masked writeback of the final partial block (no wrapper-side pad).
    big_b = 1000
    xb = jax.random.normal(kx, (big_b, input_size), jnp.float32)
    outb = jax.block_until_ready(fwd(xb, w1, b1, w2, b2))
    refb = jnp.maximum(xb @ w1 + b1, 0.0) @ w2 + b2
    assert outb.shape == (big_b, output_size)
    assert jnp.allclose(outb, refb, atol=1e-4, rtol=1e-4)

    print("KERNEL_OK")
</pallas_src>

<mosaic_0001>
module attributes {stable_mosaic.version = 11 : i64} {
  func.func @ensemble_mlp_kernel(%arg0: i32, %arg1: memref<128x4xf32, #tpu.memory_space<vmem>>, %arg2: memref<32x4xf32, #tpu.memory_space<vmem>>, %arg3: memref<32x1xf32, #tpu.memory_space<vmem>>, %arg4: memref<1x32xf32, #tpu.memory_space<vmem>>, %arg5: memref<1x1xf32, #tpu.memory_space<vmem>>, %arg6: memref<1x128xf32, #tpu.memory_space<vmem>>) attributes {dimension_semantics = [#tpu.dimension_semantics<parallel>], iteration_bounds = array<i64: 1>, scalar_prefetch = 0 : i64, scratch_operands = 0 : i64, tpu.core_type = #tpu.core_type<tc>, window_params = [{transform_indices = @transform_0, window_bounds = array<i64: 128, 4>}, {pipeline_mode = #tpu.pipeline_mode<synchronous>, transform_indices = @transform_1, window_bounds = array<i64: 32, 4>}, {pipeline_mode = #tpu.pipeline_mode<synchronous>, transform_indices = @transform_2, window_bounds = array<i64: 32, 1>}, {pipeline_mode = #tpu.pipeline_mode<synchronous>, transform_indices = @transform_3, window_bounds = array<i64: 1, 32>}, {pipeline_mode = #tpu.pipeline_mode<synchronous>, transform_indices = @transform_4, window_bounds = array<i64: 1, 1>}, {transform_indices = @transform_5, window_bounds = array<i64: 1, 128>}]} {
    %c0 = arith.constant 0 : index
    %c0_0 = arith.constant 0 : index
    %0 = vector.load %arg2[%c0, %c0_0] : memref<32x4xf32, #tpu.memory_space<vmem>>, vector<32x4xf32>
    %c0_1 = arith.constant 0 : index
    %c0_2 = arith.constant 0 : index
    %1 = vector.load %arg1[%c0_1, %c0_2] : memref<128x4xf32, #tpu.memory_space<vmem>>, vector<128x4xf32>
    %cst = arith.constant dense<0.000000e+00> : vector<32x128xf32>
    %2 = tpu.matmul %0, %1, %cst {dimension_numbers = #tpu.dot_dimension_numbers<[1], [1], [0], [0], [0, 0, 1, 0], [], []>} : vector<32x4xf32>, vector<128x4xf32>, vector<32x128xf32> -> vector<32x128xf32>
    %c0_3 = arith.constant 0 : index
    %c0_4 = arith.constant 0 : index
    %3 = vector.load %arg3[%c0_3, %c0_4] : memref<32x1xf32, #tpu.memory_space<vmem>>, vector<32x1xf32>
    %4 = vector.broadcast %3 : vector<32x1xf32> to vector<32x128xf32>
    %5 = arith.addf %2, %4 : vector<32x128xf32>
    %cst_5 = arith.constant 0.000000e+00 : f32
    %6 = vector.broadcast %cst_5 : f32 to vector<32x128xf32>
    %7 = arith.maximumf %5, %6 : vector<32x128xf32>
    %c0_6 = arith.constant 0 : index
    %c0_7 = arith.constant 0 : index
    %8 = vector.load %arg4[%c0_6, %c0_7] : memref<1x32xf32, #tpu.memory_space<vmem>>, vector<1x32xf32>
    %cst_8 = arith.constant dense<0.000000e+00> : vector<1x128xf32>
    %9 = tpu.matmul %8, %7, %cst_8 {dimension_numbers = #tpu.dot_dimension_numbers<[1], [0], [0], [1], [0, 0, 1, 1], [], []>} : vector<1x32xf32>, vector<32x128xf32>, vector<1x128xf32> -> vector<1x128xf32>
    %c0_9 = arith.constant 0 : index
    %c0_10 = arith.constant 0 : index
    %10 = vector.load %arg5[%c0_9, %c0_10] : memref<1x1xf32, #tpu.memory_space<vmem>>, vector<1x1xf32>
    %11 = vector.broadcast %10 : vector<1x1xf32> to vector<1x128xf32>
    %12 = arith.addf %9, %11 : vector<1x128xf32>
    %c0_11 = arith.constant 0 : index
    %c0_12 = arith.constant 0 : index
    %13 = vector.load %arg6[%c0_11, %c0_12] : memref<1x128xf32, #tpu.memory_space<vmem>>, vector<1x128xf32>
    tpu.vector_store %arg6[%c0_11, %c0_12], %12 {strides = array<i32>} : memref<1x128xf32, #tpu.memory_space<vmem>>, vector<1x128xf32>,
    return
  }
  func.func @transform_0(%arg0: i32) -> (i32, i32) {
    %c0_i32 = arith.constant 0 : i32
    %c0_i32_0 = arith.constant 0 : i32
    return %arg0, %c0_i32 : i32, i32
  }
  func.func @transform_1(%arg0: i32) -> (i32, i32) {
    %c0_i32 = arith.constant 0 : i32
    %c0_i32_0 = arith.constant 0 : i32
    %c0_i32_1 = arith.constant 0 : i32
    return %c0_i32, %c0_i32_0 : i32, i32
  }
  func.func @transform_2(%arg0: i32) -> (i32, i32) {
    %c0_i32 = arith.constant 0 : i32
    %c0_i32_0 = arith.constant 0 : i32
    %c0_i32_1 = arith.constant 0 : i32
    return %c0_i32, %c0_i32_0 : i32, i32
  }
  func.func @transform_3(%arg0: i32) -> (i32, i32) {
    %c0_i32 = arith.constant 0 : i32
    %c0_i32_0 = arith.constant 0 : i32
    %c0_i32_1 = arith.constant 0 : i32
    return %c0_i32, %c0_i32_0 : i32, i32
  }
  func.func @transform_4(%arg0: i32) -> (i32, i32) {
    %c0_i32 = arith.constant 0 : i32
    %c0_i32_0 = arith.constant 0 : i32
    %c0_i32_1 = arith.constant 0 : i32
    return %c0_i32, %c0_i32_0 : i32, i32
  }
  func.func @transform_5(%arg0: i32) -> (i32, i32) {
    %c0_i32 = arith.constant 0 : i32
    %c0_i32_0 = arith.constant 0 : i32
    return %c0_i32, %arg0 : i32, i32
  }
}

</mosaic_0001>

<bundles_post_ra>
// kernel: ensemble_forward.1
= control target key start
LH: loop header
LB: loop body
LE: loop exit
PB: predicated region body
PF: predicated region fallthrough
CT: control target
= control target key end

     0   :  { %s459_s0 = inlined_call_operand.vmem [shape: f32[8,4], index: 0, kind: input, shape index: {}]   ;;  %s460_s1 = inlined_call_operand.vmem [shape: f32[32,4], index: 1, kind: input, shape index: {}]   ;;  %s461_s2 = inlined_call_operand.vmem [shape: f32[32,1], index: 2, kind: input, shape index: {}]   ;;  %s462_s3 = inlined_call_operand.vmem [shape: f32[1,32], index: 3, kind: input, shape index: {}]   ;;  %s463_s4 = inlined_call_operand.<no memory space> [shape: f32[1,1], index: 4, kind: input, shape index: {}]   ;;  %s464_s5 = inlined_call_operand.hbm [shape: f32[1,8], index: 5, kind: output, shape index: {}]  }
   0x1   :  { %v10_v0 = vstv %s463_s4 }
   0x2   :  { %11 = vst [vmem:[#allocation2] sm:$0x1] %v10_v0 }
   0x3   :  { %v42_v1 = vld [vmem:[%s459_s0 + $0x78] sm:$0xff]  ;;  %vm67_vm0 = vcmask 31744   ;;  %v41_v2 = vld [vmem:[%s459_s0 + $0x70] sm:$0xff] }
   0x4   :  { %232 = vmatpush.xpose.msk.msra.mxu3 %vm67_vm0, %v42_v1  ;;  %231 = vmatpush.xpose.msk.msra.mxu2 %vm67_vm0, %v42_v1 }
   0x5   :  { %210 = vmatpush.xpose.msk.msra.mxu0 %vm67_vm0, %v42_v1 }
   0x6   :  { %12 = vsyncpa [#allocation4], 0  ;;  %v40_v3 = vld [vmem:[%s459_s0 + $0x68] sm:$0xff]  ;;  %v39_v4 = vld [vmem:[%s459_s0 + $0x60] sm:$0xff]  ;;  %v294_v11 = vmov 0   ;;  %vm169_vm1 = vcmask 261120  }
   0x7   :  { %v38_v5 = vld [vmem:[%s459_s0 + $0x58] sm:$0xff]  ;;  %v37_v6 = vld [vmem:[%s459_s0 + $0x50] sm:$0xff]  ;;  %v36_v7 = vld [vmem:[%s459_s0 + $0x48] sm:$0xff]  ;;  %265 = vset.pattern.permute.xlu0 %v294_v11  ;;  %266 = vset.pattern.permute.xlu1 %v294_v11  ;;  %s295_s15 = smov [#allocation3]   ;;  %s201_s19 = sshll.u32 %s464_s5, 4  ;;  %s202_s19 = int_to_ptr.hbm [resolvable:$true] %s201_s19 }
   0x8   :  { %234 = vmatpush.xpose.msk.msra.mxu3 %vm67_vm0, %v41_v2  ;;  %233 = vmatpush.xpose.msk.msra.mxu2 %vm67_vm0, %v41_v2  ;;  %v35_v8 = vld [vmem:[%s459_s0 + $0x40] sm:$0xff]  ;;  %v34_v9 = vld [vmem:[%s459_s0 + $0x38] sm:$0xff]  ;;  %v33_v10 = vld [vmem:[%s459_s0 + $0x30] sm:$0xff]  ;;  %s199_s16 = sshll.u32 %s295_s15, 4  ;;  %s200_s16 = int_to_ptr.vmem [resolvable:$true] %s199_s16 }
   0x9   :  { %211 = vmatpush.xpose.msk.msra.mxu0 %vm67_vm0, %v41_v2  ;;  %267 = vset.pattern.permute.xlu2 %v294_v11  ;;  %v32_v12 = vld [vmem:[%s459_s0 + $0x28] sm:$0xff]  ;;  %v46_v13 = vld [vmem:[%s461_s2 + $0x18] sm:$0xff]  ;;  %v31_v15 = vld [vmem:[%s459_s0 + $0x20] sm:$0xff] }
   0xa   :  { %v44_v14 = vld [vmem:[%s461_s2 + $0x8] sm:$0xff]  ;;  %64 = vperm.xlu0 %265, %v46_v13   ;;  %v30_v16 = vld [vmem:[%s459_s0 + $0x18] sm:$0xff]  ;;  %v45_v17 = vld [vmem:[%s461_s2 + $0x10] sm:$0xff] }
   0xb   :  { %54 = vperm.xlu1 %266, %v44_v14   ;;  %v43_v18 = vld [vmem:[%s461_s2] sm:$0xff]  ;;  %v29_v19 = vld [vmem:[%s459_s0 + $0x10] sm:$0xff]  ;;  %v28_v20 = vld [vmem:[%s459_s0 + $0x8] sm:$0xff] }
   0xc   :  { %236 = vmatpush.xpose.msk.msra.mxu3 %vm67_vm0, %v40_v3  ;;  %235 = vmatpush.xpose.msk.msra.mxu2 %vm67_vm0, %v40_v3  ;;  %v27_v21 = vld [vmem:[%s459_s0] sm:$0xff]  ;;  %v25_v22 = vld [vmem:[%s460_s1 + $0x10] sm:$0xff]  ;;  %v24_v23 = vld [vmem:[%s460_s1 + $0x8] sm:$0xff] }
   0xd   :  { %212 = vmatpush.xpose.msk.msra.mxu0 %vm67_vm0, %v40_v3  ;;  %v23_v24 = vld [vmem:[%s460_s1] sm:$0xff]  ;;  %v26_v25 = vld [vmem:[%s460_s1 + $0x18] sm:$0xff] }
   0xe   :  { %v162_v26 = vld [vmem:[#allocation2] sm:$0x1] }
   0xf   :  { %165 = vperm.xlu2 %267, %v162_v26   ;;  %v161_v43 = vld [vmem:[%s462_s3] sm:$0x1] }
  0x10   :  { %238 = vmatpush.xpose.msk.msra.mxu3 %vm67_vm0, %v39_v4  ;;  %237 = vmatpush.xpose.msk.msra.mxu2 %vm67_vm0, %v39_v4 }
  0x11   :  { %213 = vmatpush.xpose.msk.msra.mxu0 %vm67_vm0, %v39_v4 }
  0x12   :  { %59 = vperm.xlu0 %265, %v45_v17  }
  0x13   :  { %49 = vperm.xlu1 %266, %v43_v18  }
  0x14   :  { %240 = vmatpush.xpose.msk.msra.mxu3 %vm67_vm0, %v38_v5  ;;  %239 = vmatpush.xpose.msk.msra.mxu2 %vm67_vm0, %v38_v5 }
  0x15   :  { %214 = vmatpush.xpose.msk.msra.mxu0 %vm67_vm0, %v38_v5 }
  0x18   :  { %242 = vmatpush.xpose.msk.msra.mxu3 %vm67_vm0, %v37_v6  ;;  %241 = vmatpush.xpose.msk.msra.mxu2 %vm67_vm0, %v37_v6 }
  0x19   :  { %215 = vmatpush.xpose.msk.msra.mxu0 %vm67_vm0, %v37_v6 }
  0x1c   :  { %244 = vmatpush.xpose.msk.msra.mxu3 %vm67_vm0, %v36_v7  ;;  %243 = vmatpush.xpose.msk.msra.mxu2 %vm67_vm0, %v36_v7 }
  0x1d   :  { %216 = vmatpush.xpose.msk.msra.mxu0 %vm67_vm0, %v36_v7 }
  0x20   :  { %246 = vmatpush.xpose.msk.msra.mxu3 %vm67_vm0, %v35_v8  ;;  %245 = vmatpush.xpose.msk.msra.mxu2 %vm67_vm0, %v35_v8 }
  0x21   :  { %217 = vmatpush.xpose.msk.msra.mxu0 %vm67_vm0, %v35_v8 }
  0x24   :  { %248 = vmatpush.xpose.msk.msra.mxu3 %vm67_vm0, %v34_v9  ;;  %247 = vmatpush.xpose.msk.msra.mxu2 %vm67_vm0, %v34_v9 }
  0x25   :  { %218 = vmatpush.xpose.msk.msra.mxu0 %vm67_vm0, %v34_v9 }
  0x28   :  { %250 = vmatpush.xpose.msk.msra.mxu3 %vm67_vm0, %v33_v10  ;;  %249 = vmatpush.xpose.msk.msra.mxu2 %vm67_vm0, %v33_v10 }
  0x29   :  { %219 = vmatpush.xpose.msk.msra.mxu0 %vm67_vm0, %v33_v10 }
  0x2c   :  { %252 = vmatpush.xpose.msk.msra.mxu3 %vm67_vm0, %v32_v12  ;;  %251 = vmatpush.xpose.msk.msra.mxu2 %vm67_vm0, %v32_v12 }
  0x2d   :  { %220 = vmatpush.xpose.msk.msra.mxu0 %vm67_vm0, %v32_v12 }
  0x30   :  { %254 = vmatpush.xpose.msk.msra.mxu3 %vm67_vm0, %v31_v15  ;;  %253 = vmatpush.xpose.msk.msra.mxu2 %vm67_vm0, %v31_v15 }
  0x31   :  { %221 = vmatpush.xpose.msk.msra.mxu0 %vm67_vm0, %v31_v15 }
  0x34   :  { %256 = vmatpush.xpose.msk.msra.mxu3 %vm67_vm0, %v30_v16  ;;  %255 = vmatpush.xpose.msk.msra.mxu2 %vm67_vm0, %v30_v16 }
  0x35   :  { %222 = vmatpush.xpose.msk.msra.mxu0 %vm67_vm0, %v30_v16 }
  0x38   :  { %258 = vmatpush.xpose.msk.msra.mxu3 %vm67_vm0, %v29_v19  ;;  %257 = vmatpush.xpose.msk.msra.mxu2 %vm67_vm0, %v29_v19 }
  0x39   :  { %223 = vmatpush.xpose.msk.msra.mxu0 %vm67_vm0, %v29_v19 }
  0x3c   :  { %260 = vmatpush.xpose.msk.msra.mxu3 %vm67_vm0, %v28_v20  ;;  %259 = vmatpush.xpose.msk.msra.mxu2 %vm67_vm0, %v28_v20 }
  0x3d   :  { %224 = vmatpush.xpose.msk.msra.mxu0 %vm67_vm0, %v28_v20 }
  0x40   :  { %262 = vmatpush.xpose.msk.msra.mxu3 %vm67_vm0, %v27_v21  ;;  %261 = vmatpush.xpose.msk.msra.mxu2 %vm67_vm0, %v27_v21 }
  0x41   :  { %225 = vmatpush.xpose.msk.msra.mxu0 %vm67_vm0, %v27_v21 }
  0x43   :  { %228 = vmatmul.msk.f32.vlgmr.msra.gmra.mxu3 %vm67_vm0, %v25_v22  ;;  %227 = vmatmul.msk.f32.vlgmr.msra.gmra.mxu2 %vm67_vm0, %v24_v23 }
  0x44   :  { %226 = vmatmul.msk.f32.vlgmr.msra.gmra.mxu0 %vm67_vm0, %v23_v24 }
  0x4b   :  { %229 = vmatmul.msk.f32.gmra.mxu3 %vm67_vm0, %v26_v25 }
  0x69   :  { %v166_v44 = vpop.permute.xlu2 %165 }
  0x6a   :  { %v168_v45 = vperm.slane %v166_v44, 0 }
  0x7c   :  { %v65_v27 = vpop.permute.xlu0 %64 }
  0x7d   :  { %v55_v28 = vpop.permute.xlu1 %54 }
  0x84   :  { %v60_v30 = vpop.permute.xlu0 %59 }
  0x85   :  { %v50_v35 = vpop.permute.xlu1 %49 }
  0xc1   :  { %v145_v36 = vpop.f32.mrf.mxu0 }
  0xc2   :  { %v146_v40 = vadd.f32 %v145_v36, %v50_v35 }
  0xc4   :  { %v157_v42 = vmax.f32 %v146_v40, 0.0 }
  0xc6   :  { %v151_v29 = vpop.f32.mrf.mxu3  ;;  %v148_v31 = vpop.f32.mrf.mxu2 }
  0xc7   :  { %v152_v33 = vadd.f32 %v151_v29, %v60_v30  ;;  %v149_v37 = vadd.f32 %v148_v31, %v55_v28 }
  0xc9   :  { %v159_v39 = vmax.f32 %v152_v33, 0.0  ;;  %v158_v41 = vmax.f32 %v149_v37, 0.0 }
  0xce   :  { %v154_v32 = vpop.f32.mrf.mxu3 }
  0xcf   :  { %v155_v34 = vadd.f32 %v154_v32, %v65_v27 }
  0xd1   :  { %v160_v38 = vmax.f32 %v155_v34, 0.0 }
  0xd3   :  { %185 = vmatpush.msra.mxu1 %v160_v38 }
  0xd5   :  { %186 = vmatpush.msra.mxu1 %v159_v39 }
  0xd7   :  { %187 = vmatpush.msra.mxu1 %v158_v41 }
  0xd9   :  { %188 = vmatpush.msra.mxu1 %v157_v42 }
  0xda   :  { %230 = vmatmul.msk.f32.vlgmr.msra.gmra.mxu1 %vm169_vm1, %v161_v43 }
 0x157   :  { %v190_v46 = vpop.f32.mrf.mxu1 }
 0x158   :  { %v191_v47 = vadd.f32 %v190_v46, %v168_v45 }
 0x15a   :  { %193 = vst [vmem:[#allocation3] sm:$0x1] %v191_v47 }
 0x15b   :  { %204 = dma.vmem_to_hbm [thread:$0]  %s200_s16, 16, %s202_s19, [#allocation4]  }
 0x15c   :  { %292 = dma.done.wait [#allocation4], 16  }
 0x15d   :  { %293 = vsyncadd [#allocation4], 4294967280 }
 0x15e   :  { %209 = vsyncpa [#allocation4], 1 }

</bundles_post_ra>
